<compile_context>
chip_gen: v5e
topology: v5e:2x2
jax: 0.10.0
libtpu: 0.0.40
codegen_flags: <defaults>
</compile_context>

<pallas_src>
import functools
import math

import numpy as np
import jax
import jax.numpy as jnp
from jax import lax
from jax.experimental import pallas as pl
from jax.experimental.pallas import tpu as pltpu


# ----------------------------------------------------------------------------
# Host-side glue: exact PyTorch bicubic interpolation matrix (per axis).
# ----------------------------------------------------------------------------
def _cubic_coeffs(t, a=-0.75):
    # PyTorch upsample_bicubic2d cubic-convolution coefficients (a = -0.75).
    def k1(x):  # |x| <= 1
        return ((a + 2.0) * x - (a + 3.0)) * x * x + 1.0

    def k2(x):  # 1 < |x| < 2
        return ((a * x - 5.0 * a) * x + 8.0 * a) * x - 4.0 * a

    return [k2(t + 1.0), k1(t), k1(1.0 - t), k2(2.0 - t)]


def bicubic_matrix(in_size, scale_factor):
    """Dense (out, in) matrix reproducing F.interpolate(mode='bicubic',
    align_corners=False, scale_factor=scale_factor) along one axis."""
    out_size = int(math.floor(in_size * scale_factor))
    scale = 1.0 / scale_factor  # PyTorch uses 1/scale_factor when given
    A = np.zeros((out_size, in_size), dtype=np.float64)
    for j in range(out_size):
        src = scale * (j + 0.5) - 0.5
        fl = math.floor(src)
        t = src - fl
        coeffs = _cubic_coeffs(t)
        for k in range(4):
            idx = min(max(fl - 1 + k, 0), in_size - 1)  # edge clamp, as PyTorch
            A[j, idx] += coeffs[k]
    return A.astype(np.float32)


# ----------------------------------------------------------------------------
# Pallas kernel.
#   project_first == False (C_out >= C_in):
#       x_ref : (nb, C_in*H, W)   -> o_ref : (nb, C_out, Ho*Wo)   (lane-dense)
#   project_first == True  (C_out <  C_in):
#       x_ref : (nb, C_in, H*W)   -> o_ref : (nb, C_out, Ho, Wo)
#   awT_ref : (W, Wo)   ahT_ref : (H, Ho)   w_ref : (C_out, C_in)
# ----------------------------------------------------------------------------
def _downsample_kernel(x_ref, awT_ref, ahT_ref, w_ref, o_ref, *,
                       project_first, compute_dtype):
    W, Wo = awT_ref.shape
    H, Ho = ahT_ref.shape
    C_out, C_in = w_ref.shape
    nb = x_ref.shape[0]

    if project_first:
        # ---- 1x1 projection first (C_out < C_in): batched MXU matmul. ----
        x = x_ref[...].astype(compute_dtype)                       # (nb, C_in, H*W)
        wb = jnp.broadcast_to(w_ref[...][None], (nb, C_out, C_in))
        t = lax.dot_general(wb, x,
                            dimension_numbers=(((2,), (1,)), ((0,), (0,))),
                            preferred_element_type=jnp.float32)
        t = t.astype(compute_dtype)                                # (nb, C_out, H*W)
        C_sp = C_out
        t = t.reshape(nb * C_sp * H, W)
    else:
        C_sp = C_in
        t = x_ref[...].reshape(nb * C_sp * H, W).astype(compute_dtype)

    # ---- W pass: contract W on the MXU; cast bf16 BEFORE any relayout. ----
    t = jnp.dot(t, awT_ref[...], preferred_element_type=jnp.float32)
    t = t.astype(compute_dtype)                                    # (nb*C_sp*H, Wo)
    t = t.reshape(nb * C_sp, H, Wo)
    t = jnp.swapaxes(t, 1, 2).reshape(nb * C_sp * Wo, H)           # lane dim -> H

    # ---- H pass: contract H on the MXU; cast BEFORE the relayout back. ----
    t = jnp.dot(t, ahT_ref[...], preferred_element_type=jnp.float32)

    if project_first:
        # Spatial passes were already on C_out channels: transpose back & store.
        t = t.astype(o_ref.dtype)
        t = t.reshape(nb * C_sp, Wo, Ho)
        t = jnp.swapaxes(t, 1, 2)                                  # (nb*C_out, Ho, Wo)
        o_ref[...] = t.reshape(nb, C_out, Ho, Wo)
    else:
        t = t.astype(compute_dtype)
        t = t.reshape(nb * C_sp, Wo, Ho)
        t = jnp.swapaxes(t, 1, 2)                                  # (nb*C_in, Ho, Wo)
        t = t.reshape(nb, C_in, Ho * Wo)                           # lane-dense S
        # ---- 1x1 projection last: single batched MXU matmul over nb. ----
        wb = jnp.broadcast_to(w_ref[...][None], (nb, C_out, C_in))
        y = lax.dot_general(wb, t,
                            dimension_numbers=(((2,), (1,)), ((0,), (0,))),
                            preferred_element_type=jnp.float32)
        o_ref[...] = y.astype(o_ref.dtype)                         # (nb, C_out, Ho*Wo)


def _pick_batch_block(N, per_batch_in_bytes, per_batch_total_bytes, vmem_budget):
    """nb sized by VMEM budget + ~4 MiB DMA target; grid kept >= 2 when N >= 2."""
    nb_vmem = max(1, vmem_budget // max(1, per_batch_total_bytes))
    nb_dma = max(1, -(-(4 * 1024 * 1024) // max(1, per_batch_in_bytes)))
    nb = max(1, min(N, nb_vmem, nb_dma))
    if N >= 2:
        nb = min(nb, -(-N // 2))   # keep the parallel grid axis >= 2 (v7x: 2 TCs)
    return nb


def downsample(x, v, g, *, stride=2, compute_dtype=jnp.bfloat16):
    """x: (N, C_in, H, W) NCHW; v: (C_out, C_in, 1, 1); g: (C_out, 1, 1, 1).

    Output dtype == input dtype (bf16 in -> bf16 out).  Pass
    compute_dtype=jnp.float32 for exact-parity MXU math (slower)."""
    N, C_in, H, W = x.shape
    C_out = v.shape[0]
    out_dtype = x.dtype

    # weight_norm (dim=0): w = g * v / ||v||, norm over all dims except 0.
    v2 = v.reshape(C_out, C_in).astype(jnp.float32)
    norm = jnp.sqrt(jnp.sum(v2 * v2, axis=1, keepdims=True))
    w_proj = (g.reshape(C_out, 1).astype(jnp.float32) * v2 / norm).astype(compute_dtype)

    # Separable per-axis bicubic matrices (transposed: kernel contracts last dim).
    Ah = bicubic_matrix(H, 1.0 / stride)                     # (Ho, H)
    Aw = bicubic_matrix(W, 1.0 / stride)                     # (Wo, W)
    Ho, Wo = Ah.shape[0], Aw.shape[0]
    ahT = jnp.asarray(Ah.T, dtype=compute_dtype)             # (H, Ho)
    awT = jnp.asarray(Aw.T, dtype=compute_dtype)             # (W, Wo)

    project_first = C_out < C_in       # hoist 1x1 projection when it shrinks work
    C_sp = C_out if project_first else C_in

    in_isz = x.dtype.itemsize
    out_isz = jnp.dtype(out_dtype).itemsize
    cd_isz = jnp.dtype(compute_dtype).itemsize

    # Rough per-batch-element VMEM footprint (double-buffered I/O + live temps).
    per_batch = (2 * C_in * H * W * in_isz
                 + 2 * C_out * Ho * Wo * out_isz
                 + C_sp * H * W * cd_isz
                 + C_sp * H * Wo * (4 + 2 * cd_isz)
                 + C_sp * Wo * Ho * (4 + 2 * cd_isz)
                 + C_out * Ho * Wo * 4
                 + (C_out * H * W * (4 + cd_isz) if project_first else 0))
    per_batch_in = C_in * H * W * in_isz

    try:
        vmem_cap = int(pltpu.get_tpu_info().vmem_capacity_bytes)
    except Exception:
        vmem_cap = 64 * 1024 * 1024    # conservative: v7x per-TensorCore VMEM

    nb = _pick_batch_block(N, per_batch_in, per_batch, int(vmem_cap * 0.6))
    grid = (pl.cdiv(N, nb),)
    vmem_limit = min(int(vmem_cap * 0.9), 128 * 1024 * 1024)

    if project_first:
        x_in = x.reshape(N, C_in, H * W)                     # metadata-only
        in_spec_x = pl.BlockSpec((nb, C_in, H * W), lambda i: (i, 0, 0))
        out_shape = jax.ShapeDtypeStruct((N, C_out, Ho, Wo), out_dtype)
        out_spec = pl.BlockSpec((nb, C_out, Ho, Wo), lambda i: (i, 0, 0, 0))
    else:
        x_in = x.reshape(N, C_in * H, W)                     # metadata-only
        in_spec_x = pl.BlockSpec((nb, C_in * H, W), lambda i: (i, 0, 0))
        out_shape = jax.ShapeDtypeStruct((N, C_out, Ho * Wo), out_dtype)
        out_spec = pl.BlockSpec((nb, C_out, Ho * Wo), lambda i: (i, 0, 0))

    flops = (2 * N * C_sp * H * W * Wo                       # W pass
             + 2 * N * C_sp * Wo * H * Ho                    # H pass
             + 2 * N * C_out * C_in * (H * W if project_first else Ho * Wo))
    bytes_accessed = (x.size * in_isz
                      + N * C_out * Ho * Wo * out_isz
                      + cd_isz * (W * Wo + H * Ho + C_out * C_in))

    kernel = functools.partial(_downsample_kernel,
                               project_first=project_first,
                               compute_dtype=compute_dtype)

    out = pl.pallas_call(
        kernel,
        out_shape=out_shape,
        grid=grid,
        in_specs=[in_spec_x,
                  pl.BlockSpec((W, Wo), lambda i: (0, 0)),
                  pl.BlockSpec((H, Ho), lambda i: (0, 0)),
                  pl.BlockSpec((C_out, C_in), lambda i: (0, 0))],
        out_specs=out_spec,
        compiler_params=pltpu.CompilerParams(
            dimension_semantics=("parallel",),
            vmem_limit_bytes=vmem_limit),
        cost_estimate=pl.CostEstimate(flops=flops, transcendentals=0,
                                      bytes_accessed=bytes_accessed),
    )(x_in, awT, ahT, w_proj)

    return out.reshape(N, C_out, Ho, Wo)


if __name__ == "__main__":
    key = jax.random.PRNGKey(0)
    kx, kv = jax.random.split(key)

    def reference(x, v, g, stride):
        # Pure-JAX f32 reference of the same math (separable bicubic, then 1x1).
        N, C_in, H, W = x.shape
        C_out = v.shape[0]
        Ah = jnp.asarray(bicubic_matrix(H, 1.0 / stride), jnp.float32)
        Aw = jnp.asarray(bicubic_matrix(W, 1.0 / stride), jnp.float32)
        v2 = v.reshape(C_out, C_in).astype(jnp.float32)
        wmat = (g.reshape(C_out, 1).astype(jnp.float32) * v2
                / jnp.sqrt(jnp.sum(v2 * v2, axis=1, keepdims=True)))
        xd = jnp.einsum("ph,nchw,qw->ncpq", Ah, x.astype(jnp.float32), Aw)
        return jnp.einsum("kc,ncpq->nkpq", wmat, xd)

    def run_case(N, C_in, C_out, H, W, stride, dtype):
        kxi = jax.random.fold_in(kx, C_in * 1000 + C_out)
        kvi = jax.random.fold_in(kv, C_in * 1000 + C_out)
        x = jax.random.normal(kxi, (N, C_in, H, W), dtype=jnp.float32)
        v = jax.random.normal(kvi, (C_out, C_in, 1, 1), dtype=jnp.float32) * 0.2
        g = jnp.sqrt(jnp.sum(v.reshape(C_out, -1) ** 2, axis=1)).reshape(C_out, 1, 1, 1)

        out = jax.block_until_ready(downsample(x.astype(dtype), v, g, stride=stride))
        assert out.shape == (N, C_out, H // stride, W // stride), out.shape
        assert out.dtype == jnp.dtype(dtype), out.dtype

        ref = reference(x, v, g, stride)
        # bf16 MXU operands with f32 accumulation -> loose tolerance.
        np.testing.assert_allclose(np.asarray(out, dtype=np.float32),
                                   np.asarray(ref), rtol=5e-2, atol=5e-2)

    # Main path (C_out >= C_in: spatial passes then projection), f32 I/O.
    run_case(N=2, C_in=4, C_out=8, H=16, W=16, stride=2, dtype=jnp.float32)
    # Hoisted-projection path (C_out < C_in: projection first).
    run_case(N=2, C_in=8, C_out=4, H=16, W=16, stride=2, dtype=jnp.float32)
    # bf16 I/O path (half HBM traffic in and out, output dtype follows input).
    run_case(N=2, C_in=4, C_out=8, H=16, W=16, stride=2, dtype=jnp.bfloat16)

    print("KERNEL_OK")
</pallas_src>

<mosaic_0001>
module attributes {stable_mosaic.version = 11 : i64} {
  func.func @_downsample_kernel(%arg0: i32, %arg1: memref<1x64x16xf32, #tpu.memory_space<vmem>>, %arg2: memref<16x8xbf16, #tpu.memory_space<vmem>>, %arg3: memref<16x8xbf16, #tpu.memory_space<vmem>>, %arg4: memref<8x4xbf16, #tpu.memory_space<vmem>>, %arg5: memref<1x8x64xf32, #tpu.memory_space<vmem>>) attributes {dimension_semantics = [#tpu.dimension_semantics<parallel>], iteration_bounds = array<i64: 2>, scalar_prefetch = 0 : i64, scratch_operands = 0 : i64, tpu.core_type = #tpu.core_type<tc>, window_params = [{transform_indices = @transform_0, window_bounds = array<i64: 1, 64, 16>}, {pipeline_mode = #tpu.pipeline_mode<synchronous>, transform_indices = @transform_1, window_bounds = array<i64: 16, 8>}, {pipeline_mode = #tpu.pipeline_mode<synchronous>, transform_indices = @transform_2, window_bounds = array<i64: 16, 8>}, {pipeline_mode = #tpu.pipeline_mode<synchronous>, transform_indices = @transform_3, window_bounds = array<i64: 8, 4>}, {transform_indices = @transform_4, window_bounds = array<i64: 1, 8, 64>}]} {
    %c0 = arith.constant 0 : index
    %c0_0 = arith.constant 0 : index
    %c0_1 = arith.constant 0 : index
    %0 = vector.load %arg1[%c0, %c0_0, %c0_1] : memref<1x64x16xf32, #tpu.memory_space<vmem>>, vector<1x64x16xf32>
    %1 = vector.shape_cast %0 : vector<1x64x16xf32> to vector<64x16xf32>
    %2 = arith.truncf %1 : vector<64x16xf32> to vector<64x16xbf16>
    %c0_2 = arith.constant 0 : index
    %c0_3 = arith.constant 0 : index
    %3 = vector.load %arg2[%c0_2, %c0_3] : memref<16x8xbf16, #tpu.memory_space<vmem>>, vector<16x8xbf16>
    %cst = arith.constant dense<0.000000e+00> : vector<64x8xf32>
    %4 = tpu.matmul %2, %3, %cst {dimension_numbers = #tpu.dot_dimension_numbers<[1], [0], [0], [1], [0, 0, 1, 1], [], []>} : vector<64x16xbf16>, vector<16x8xbf16>, vector<64x8xf32> -> vector<64x8xf32>
    %5 = arith.truncf %4 : vector<64x8xf32> to vector<64x8xbf16>
    %6 = vector.shape_cast %5 : vector<64x8xbf16> to vector<4x16x8xbf16>
    %7 = tpu.transpose %6, [0, 2, 1] : vector<4x16x8xbf16> -> vector<4x8x16xbf16>
    %8 = vector.shape_cast %7 : vector<4x8x16xbf16> to vector<32x16xbf16>
    %c0_4 = arith.constant 0 : index
    %c0_5 = arith.constant 0 : index
    %9 = vector.load %arg3[%c0_4, %c0_5] : memref<16x8xbf16, #tpu.memory_space<vmem>>, vector<16x8xbf16>
    %cst_6 = arith.constant dense<0.000000e+00> : vector<32x8xf32>
    %10 = tpu.matmul %8, %9, %cst_6 {dimension_numbers = #tpu.dot_dimension_numbers<[1], [0], [0], [1], [0, 0, 1, 1], [], []>} : vector<32x16xbf16>, vector<16x8xbf16>, vector<32x8xf32> -> vector<32x8xf32>
    %11 = arith.truncf %10 : vector<32x8xf32> to vector<32x8xbf16>
    %12 = vector.shape_cast %11 : vector<32x8xbf16> to vector<4x8x8xbf16>
    %13 = tpu.transpose %12, [0, 2, 1] : vector<4x8x8xbf16> -> vector<4x8x8xbf16>
    %14 = vector.shape_cast %13 : vector<4x8x8xbf16> to vector<1x4x64xbf16>
    %c0_7 = arith.constant 0 : index
    %c0_8 = arith.constant 0 : index
    %15 = vector.load %arg4[%c0_7, %c0_8] : memref<8x4xbf16, #tpu.memory_space<vmem>>, vector<8x4xbf16>
    %16 = vector.shape_cast %15 : vector<8x4xbf16> to vector<1x8x4xbf16>
    %cst_9 = arith.constant dense<0.000000e+00> : vector<1x8x64xf32>
    %17 = tpu.matmul %16, %14, %cst_9 {dimension_numbers = #tpu.dot_dimension_numbers<[2], [1], [1], [2], [0, 0, 0, 1, 1, 2], [0], [0]>} : vector<1x8x4xbf16>, vector<1x4x64xbf16>, vector<1x8x64xf32> -> vector<1x8x64xf32>
    %c0_10 = arith.constant 0 : index
    %c0_11 = arith.constant 0 : index
    %c0_12 = arith.constant 0 : index
    %18 = vector.load %arg5[%c0_10, %c0_11, %c0_12] : memref<1x8x64xf32, #tpu.memory_space<vmem>>, vector<1x8x64xf32>
    tpu.vector_store %arg5[%c0_10, %c0_11, %c0_12], %17 {strides = array<i32>} : memref<1x8x64xf32, #tpu.memory_space<vmem>>, vector<1x8x64xf32>,
    return
  }
  func.func @transform_0(%arg0: i32) -> (i32, i32, i32) {
    %c0_i32 = arith.constant 0 : i32
    %c0_i32_0 = arith.constant 0 : i32
    %c0_i32_1 = arith.constant 0 : i32
    return %arg0, %c0_i32, %c0_i32_0 : i32, i32, i32
  }
  func.func @transform_1(%arg0: i32) -> (i32, i32) {
    %c0_i32 = arith.constant 0 : i32
    %c0_i32_0 = arith.constant 0 : i32
    %c0_i32_1 = arith.constant 0 : i32
    return %c0_i32, %c0_i32_0 : i32, i32
  }
  func.func @transform_2(%arg0: i32) -> (i32, i32) {
    %c0_i32 = arith.constant 0 : i32
    %c0_i32_0 = arith.constant 0 : i32
    %c0_i32_1 = arith.constant 0 : i32
    return %c0_i32, %c0_i32_0 : i32, i32
  }
  func.func @transform_3(%arg0: i32) -> (i32, i32) {
    %c0_i32 = arith.constant 0 : i32
    %c0_i32_0 = arith.constant 0 : i32
    %c0_i32_1 = arith.constant 0 : i32
    return %c0_i32, %c0_i32_0 : i32, i32
  }
  func.func @transform_4(%arg0: i32) -> (i32, i32, i32) {
    %c0_i32 = arith.constant 0 : i32
    %c0_i32_0 = arith.constant 0 : i32
    %c0_i32_1 = arith.constant 0 : i32
    return %arg0, %c0_i32, %c0_i32_0 : i32, i32, i32
  }
}

</mosaic_0001>

<bundles_post_ra>
// kernel: tpu_custom_call.1
= control target key start
LH: loop header
LB: loop body
LE: loop exit
PB: predicated region body
PF: predicated region fallthrough
CT: control target
= control target key end

     0   :  { %9 = vsyncpa [#allocation3], 0  ;;  %s970_s0 = inlined_call_operand.vmem [shape: f32[2,64,16], index: 0, kind: input, shape index: {}]   ;;  %s971_s1 = inlined_call_operand.vmem [shape: bf16[16,8], index: 1, kind: input, shape index: {}]   ;;  %s972_s2 = inlined_call_operand.vmem [shape: bf16[16,8], index: 2, kind: input, shape index: {}]   ;;  %s973_s3 = inlined_call_operand.vmem [shape: bf16[8,4], index: 3, kind: input, shape index: {}]   ;;  %s974_s4 = inlined_call_operand.hbm [shape: f32[2,8,64], index: 4, kind: output, shape index: {}]  }
   0x1   :  { %11 = vsyncpa [#allocation3 + $0x1], 0  ;;  %s861_s15 = smov 0   ;;  %s863_s16 = smov 0  }
   0x2   :  { %s865_s17 = smov 0   ;;  %s867_s18 = smov 0  }
   0x3 LB: > { %s882_s19 = sadd.s32 4294967295, %s825_s18   ;;  %s672_s20 = sadd.s32 4294967294, %s825_s18   ;;  %s825_s18 = sphi %s867_s18, %s980_s18   ;;  %s821_s17 = sphi %s865_s17, %s979_s17   ;;  %s817_s16 = sphi %s863_s16, %s978_s16   ;;  %s813_s15 = sphi %s861_s15, %s977_s15  }
   0x4   : > { %s886_s21 = sadd.s32 1, %s825_s18   ;;  %s113_s22 = sadd.s32 1, %s821_s17 }
   0x5   : > { %s110_s23 = ssub.s32 %s825_s18, %s886_s21  ;;  %p123_p0 = scmp.ne.s32.totalorder %s821_s17, %s817_s16 }
   0x6   : > { %p111_p1 = scmp.eq.s32.totalorder %s110_s23, 0  ;;  %p124_p2 = scmp.eq.s32.totalorder %s882_s19, 1 }
   0x7   : > { %p129_p3 = scmp.ne.s32.totalorder %s817_s16, %s813_s15  ;;  %p130_p4 = scmp.eq.s32.totalorder %s672_s20, 1 }
   0x8   : > { %s897_s24 = scalar_select %p111_p1, %s821_s17, %s113_s22  }
   0x9   : > { %p899_p5 = por %p124_p2, %p123_p0  ;;  %p903_p6 = por %p130_p4, %p129_p3 }
   0xa   : > { %p675_p7 = scmp.ge.s32.totalorder %s825_s18, 1  ;;  %p165_p8 = scmp.lt.s32.totalorder %s825_s18, 3 }
   0xc   : > { %p166_p9 = pnand %p675_p7, %p165_p8 }
   0xd   : > { %p191_p10 = scmp.lt.s32.totalorder (!%p166_p9), %s882_s19, 1  ;;  %s829_s10 = smov (!%p166_p9), 32  }
   0xe   : > { %169 = sbr.rel (%p166_p9) target bundleno = 978 (0x3d2), region = 36  ;;  %s830_s11 = smov (!%p166_p9), 40  }
   0xf   : > { %s831_s12 = smov (!%p166_p9), 48   ;;  %s832_s13 = smov (!%p166_p9), 8  }
  0x10   : > { %s833_s14 = smov (!%p166_p9), 16   ;;  %s834_s20 = smov (!%p166_p9), 24  }
  0x11   : > { %s835_s22 = smov (!%p166_p9), 56   ;;  %s188_s28 = sand.u32 (!%p166_p9), 1, %s817_s16  }
  0x13   : > { %v699_v0 = vld [vmem:[%s971_s1] sm:$0xff]  ;;  %s192_s29 = scalar_select %p191_p10, %s882_s19, 1  ;;  %vm217_vm0 = vcmask 130048   ;;  %v827_v61 = vmov 1983009808   ;;  %vm475_vm1 = vcmask 1047556  }
  0x14   : > { %237 = vmatpush.bf16.msra.mxu0 %v699_v0  ;;  %701 = vmatpush.bf16.msra.mxu3 %v699_v0  ;;  %v700_v41 = vld [vmem:[%s972_s2] sm:$0xff]  ;;  %v467_v62 = vunpack.c.l.s4 %v827_v61  ;;  %vm553_vm2 = vcmask 64512   ;;  %vm559_vm3 = vcmask 195584   ;;  %vm562_vm4 = vcmask 261120  }
  0x15   : > { %s698_s30 = sshll.u32 %s192_s29, 6  ;;  %386 = vmatpush.bf16.msra.mxu1 %v700_v41  ;;  %vm565_vm5 = vcmask 326656   ;;  %vm568_vm6 = vcmask 392192   ;;  %vm571_vm7 = vcmask 457728   ;;  %vm579_vm8 = vcmask 1041408   ;;  %s695_s29 = sshll.u32 %s882_s19, 3 }
  0x16   : > { %s195_s7 = scalar_lea.vmem %s970_s0, %s698_s30  ;;  %v468_v0 = vunpack.c.0.s8 %v467_v62  ;;  %v574_v61 = vld [vmem:[%s973_s3] sm:$0xf]  ;;  %vm575_vm9 = vcmask 31744   ;;  %s676_s30 = sshll.u32 %s188_s28, 3  ;;  %vm595_vm10 = vcmask 523264  }
  0x17   : > { %v197_v1 = vld [vmem:[%s195_s7] sm:$0xff]  ;;  %v198_v2 = vld [vmem:[%s195_s7 + $0x8] sm:$0xff]  ;;  %v199_v7 = vld [vmem:[%s195_s7 + $0x10] sm:$0xff]  ;;  %s190_s8 = scalar_lea.vmem [#allocation2], %s676_s30 }
  0x18   : > { %v201_v3 = vld [vmem:[%s195_s7 + $0x20] sm:$0xff]  ;;  %v205_v4 = vpack.c.bf16 %v198_v2, %v197_v1  ;;  %v202_v5 = vld [vmem:[%s195_s7 + $0x28] sm:$0xff]  ;;  %v200_v8 = vld [vmem:[%s195_s7 + $0x18] sm:$0xff]  ;;  %v828_v2 = vmov 1934713408   ;;  %s610_s9 = sshll.u32 %s190_s8, 4  ;;  %s611_s9 = int_to_ptr.vmem [resolvable:$true] %s610_s9 }
  0x19   : > { %v207_v6 = vpack.c.bf16 %v202_v5, %v201_v3  ;;  %v203_v9 = vld [vmem:[%s195_s7 + $0x30] sm:$0xff]  ;;  %v204_v10 = vld [vmem:[%s195_s7 + $0x38] sm:$0xff]  ;;  %v206_v11 = vpack.c.bf16 %v200_v8, %v199_v7  ;;  %v480_v3 = vunpack.c.l.s4 %v828_v2  ;;  %s608_s7 = scalar_lea.hbm %s974_s4, %s695_s29 }
  0x1a   : > { %683 = vmatmul.msk.bf16.vlgmr.msra.gmra.mxu0 %vm217_vm0, %v205_v4  ;;  %v208_v12 = vpack.c.bf16 %v204_v10, %v203_v9 }
  0x1b   : > { %685 = vmatmul.msk.bf16.vlgmr.msra.gmra.mxu3 %vm217_vm0, %v207_v6  ;;  %v481_v7 = vunpack.c.0.s8 %v480_v3 }
  0x2a   : > { %684 = vmatmul.msk.bf16.gmra.mxu0 %vm217_vm0, %v206_v11 }
  0x2b   : > { %686 = vmatmul.msk.bf16.gmra.mxu3 %vm217_vm0, %v208_v12 }
  0x97   : > { %v239_v13 = vpop.f32.mrf.mxu0 }
  0x98   : > { %v259_v19 = vpack.c.bf16 %v239_v13, %v239_v13 }
  0x9a   : > { %v275_v25 = vunpack.c.l.b16 %v259_v19 }
  0x9e   : > { %v249_v14 = vpop.f32.mrf.mxu3 }
  0x9f   : > { %v241_v15 = vpop.f32.mrf.mxu0  ;;  %v263_v31 = vpack.c.bf16 %v249_v14, %v249_v14 }
  0xa0   : > { %v260_v18 = vpack.c.bf16 %v241_v15, %v241_v15 }
  0xa1   : > { %v279_v35 = vunpack.c.l.b16 %v263_v31 }
  0xa2   : > { %v276_v23 = vunpack.c.l.b16 %v260_v18 }
  0xa4   : > { %v283_v28 = vpack.c.b16 %v276_v23, %v275_v25 }
  0xa6   : > { %v251_v16 = vpop.f32.mrf.mxu3 }
  0xa7   : > { %v244_v17 = vpop.f32.mrf.mxu0  ;;  %v264_v32 = vpack.c.bf16 %v251_v16, %v251_v16 }
  0xa8   : > { %v261_v20 = vpack.c.bf16 %v244_v17, %v244_v17 }
  0xa9   : > { %v280_v36 = vunpack.c.l.b16 %v264_v32 }
  0xaa   : > { %v277_v26 = vunpack.c.l.b16 %v261_v20 }
  0xab   : > { %v285_v39 = vpack.c.b16 %v280_v36, %v279_v35 }
  0xae   : > { %v254_v22 = vpop.f32.mrf.mxu3 }
  0xaf   : > { %v246_v21 = vpop.f32.mrf.mxu0  ;;  %v265_v33 = vpack.c.bf16 %v254_v22, %v254_v22 }
  0xb0   : > { %v262_v24 = vpack.c.bf16 %v246_v21, %v246_v21 }
  0xb1   : > { %v281_v37 = vunpack.c.l.b16 %v265_v33 }
  0xb2   : > { %v278_v27 = vunpack.c.l.b16 %v262_v24 }
  0xb4   : > { %v284_v29 = vpack.c.b16 %v278_v27, %v277_v26 }
  0xb6   : > { %751 = vxpose.binary.xlu0.c.b16.start.end [1/2] (short) (narrow) %v284_v29, %v283_v28, 16  ;;  %v256_v30 = vpop.f32.mrf.mxu3 }
  0xb7   : > { %v266_v34 = vpack.c.bf16 %v256_v30, %v256_v30 }
  0xb9   : > { %v282_v38 = vunpack.c.l.b16 %v266_v34 }
  0xbb   : > { %v286_v40 = vpack.c.b16 %v282_v38, %v281_v37 }
  0xc6   : > { %754 = vxpose.binary.xlu0.c.b16.start.end [1/2] (short) (narrow) %v286_v40, %v285_v39, 16 }
 0x162   : > { %v752_v42 = vpop.trf.xlu0 }
 0x163   : > { %v361_v44 = vunpack.c.l.b16 %v752_v42 }
 0x16a   : > { %v753_v43 = vpop.trf.xlu0 }
 0x16b   : > { %v362_v45 = vunpack.c.l.b16 %v753_v43 }
 0x16d   : > { %v365_v46 = vpack.c.b16 %v362_v45, %v361_v44 }
 0x16f   : > { %691 = vmatmul.msk.bf16.vlgmr.msra.gmra.mxu1 %vm217_vm0, %v365_v46 }
 0x172   : > { %v755_v47 = vpop.trf.xlu0 }
 0x173   : > { %v363_v49 = vunpack.c.l.b16 %v755_v47 }
 0x17a   : > { %v756_v48 = vpop.trf.xlu0 }
 0x17b   : > { %v364_v50 = vunpack.c.l.b16 %v756_v48 }
 0x17d   : > { %v366_v51 = vpack.c.b16 %v364_v50, %v363_v49 }
 0x17f   : > { %692 = vmatmul.msk.bf16.gmra.mxu1 %vm217_vm0, %v366_v51 }
 0x1ec   : > { %v388_v52 = vpop.f32.mrf.mxu1 }
 0x1ed   : > { %v398_v54 = vpack.c.bf16 %v388_v52, %v388_v52 }
 0x1f4   : > { %v390_v53 = vpop.f32.mrf.mxu1 }
 0x1f5   : > { %v399_v55 = vpack.c.bf16 %v390_v53, %v390_v53 }
 0x1f7   : > { %757 = vxpose.binary.xlu1.c.b16.start.end [1/2] (short) (narrow) %v399_v55, %v398_v54, 16 }
 0x1fc   : > { %v393_v56 = vpop.f32.mrf.mxu1 }
 0x1fd   : > { %v400_v58 = vpack.c.bf16 %v393_v56, %v393_v56 }
 0x204   : > { %v395_v57 = vpop.f32.mrf.mxu1 }
 0x205   : > { %v401_v59 = vpack.c.bf16 %v395_v57, %v395_v57 }
 0x207   : > { %760 = vxpose.binary.xlu1.c.b16.start.end [1/2] (short) (narrow) %v401_v59, %v400_v58, 16 }
 0x2a3   : > { %v758_v60 = vpop.trf.xlu1 }
 0x2a4   : > { %v469_v1 = vperm.slane %v758_v60, %v468_v0 }
 0x2a6   : > { %v477_v6 = vrot.slane %v469_v1, 4 }
 0x2ab   : > { %v759_v63 = vpop.trf.xlu1 }
 0x2ac   : > { %v494_v8 = vperm.slane %v759_v63, %v468_v0 }
 0x2ae   : > { %v501_v13 = vrot.slane %v494_v8, 4 }
 0x2b3   : > { %v761_v4 = vpop.trf.xlu1 }
 0x2b4   : > { %v473_v5 = vperm.slane %v761_v4, %v468_v0 }
 0x2b6   : > { %v478_v9 = vsel %vm475_vm1, %v473_v5, %v477_v6  ;;  %v474_v10 = vrot.slane %v473_v5, 4 }
 0x2b7   : > { %v486_v11 = vperm.slane %v478_v9, %v481_v7 }
 0x2b8   : > { %v476_v17 = vsel %vm475_vm1, %v474_v10, %v469_v1 }
 0x2b9   : > { %v489_v19 = vrot.slane %v486_v11, 4  ;;  %v530_v21 = vshrl.u32 %v486_v11, 16  ;;  %v482_v26 = vperm.slane %v476_v17, %v481_v7 }
 0x2bb   : > { %v762_v12 = vpop.trf.xlu1  ;;  %v490_v28 = vsel %vm475_vm1, 0, %v489_v19  ;;  %v518_v33 = vshrl.u32 %v482_v26, 16  ;;  %v487_v36 = vrot.slane %v482_v26, 4 }
 0x2bc   : > { %v498_v14 = vperm.slane %v762_v12, %v468_v0  ;;  %v536_v44 = vshrl.u32 %v490_v28, 16 }
 0x2bd   : > { %v488_v38 = vsel %vm475_vm1, 0, %v487_v36 }
 0x2be   : > { %v499_v15 = vrot.slane %v498_v14, 4  ;;  %v502_v16 = vsel %vm475_vm1, %v498_v14, %v501_v13  ;;  %v524_v41 = vshrl.u32 %v488_v38, 16 }
 0x2bf   : > { %v510_v18 = vperm.slane %v502_v16, %v481_v7 }
 0x2c0   : > { %v500_v20 = vsel %vm475_vm1, %v499_v15, %v494_v8 }
 0x2c1   : > { %v506_v22 = vperm.slane %v500_v20, %v481_v7  ;;  %v529_v23 = vpack.i.b16 %v510_v18, %v486_v11  ;;  %v531_v24 = vshrl.u32 %v510_v18, 16  ;;  %v513_v25 = vrot.slane %v510_v18, 4 }
 0x2c3   : > { %545 = vrot.lane.b32.xlu0 %v529_v23, %s829_s10  ;;  %v532_v27 = vpack.i.b16 %v531_v24, %v530_v21  ;;  %v514_v29 = vsel %vm475_vm1, 0, %v513_v25  ;;  %v517_v31 = vpack.i.b16 %v506_v22, %v482_v26  ;;  %v519_v32 = vshrl.u32 %v506_v22, 16  ;;  %s612_s10 = sshll.u32 %s608_s7, 4  ;;  %s613_s10 = int_to_ptr.hbm [resolvable:$true] %s612_s10 }
 0x2c4   : > { %v535_v30 = vpack.i.b16 %v514_v29, %v490_v28  ;;  %v511_v35 = vrot.slane %v506_v22, 4  ;;  %v537_v43 = vshrl.u32 %v514_v29, 16 }
 0x2c5   : > { %547 = vrot.lane.b32.xlu1 %v532_v27, %s830_s11  ;;  %v520_v34 = vpack.i.b16 %v519_v32, %v518_v33  ;;  %s598_s11 = scalar_lea.sflag [#allocation3], %s188_s28 }
 0x2c6   : > { %549 = vrot.lane.b32.xlu2 %v535_v30, %s831_s12  ;;  %v512_v37 = vsel %vm475_vm1, 0, %v511_v35  ;;  %v538_v45 = vpack.i.b16 %v537_v43, %v536_v44  ;;  %s777_s12 = sshra.s32 %s613_s10, 4  ;;  %s778_s12 = int_to_ptr.hbm [resolvable:$true] %s777_s12 }
 0x2c7   : > { %v523_v39 = vpack.i.b16 %v512_v37, %v488_v38  ;;  %v525_v40 = vshrl.u32 %v512_v37, 16  ;;  %p784_p0 = scmp.lt.s32.totalorder %s778_s12, %s974_s4 }
 0x2c9   : > { %v526_v42 = vpack.i.b16 %v525_v40, %v524_v41 }
 0x2ce   : > { %539 = vrot.lane.b32.xlu2 %v520_v34, %s832_s13  ;;  %s779_s13 = scalar_lea.hbm %s778_s12, 8 }
 0x2cf   : > { %p780_p11 = scmp.ne.s32.totalorder %s778_s12, %s779_s13 }
 0x2d1   : > { %p781_p12 = pnand %p780_p11, %p899_p5 }
 0x2d3   : > { %p782_p13 = pneg %p781_p12 }
 0x2d6   : > { %541 = vrot.lane.b32.xlu2 %v523_v39, %s833_s14 }
 0x2de   : > { %543 = vrot.lane.b32.xlu2 %v526_v42, %s834_s20  ;;  %s783_s20 = scalar_lea.hbm %s974_s4, 16 }
 0x2df   : > { %p785_p1 = scmp.lt.s32.totalorder %s783_s20, %s779_s13 }
 0x2e1   : > { %p786_p2 = por %p785_p1, %p784_p0 }
 0x2e3   : > { %p787_p3 = pnand %p786_p2, %p782_p13 }
 0x2e6   : > { %551 = vrot.lane.b32.xlu2 %v538_v45, %s835_s22 }
 0x320   : > { %v550_v46 = vpop.permute.xlu2 %549 }
 0x328   : > { %v540_v47 = vpop.permute.xlu2 %539 }
 0x329   : > { %v556_v49 = vsel %vm553_vm2, %v517_v31, %v540_v47 }
 0x330   : > { %v542_v48 = vpop.permute.xlu2 %541 }
 0x331   : > { %v558_v50 = vsel %vm217_vm0, %v556_v49, %v542_v48 }
 0x335   : > { %v546_v52 = vpop.permute.xlu0 %545 }
 0x337   : > { %v548_v55 = vpop.permute.xlu1 %547 }
 0x338   : > { %v544_v51 = vpop.permute.xlu2 %543 }
 0x339   : > { %v561_v53 = vsel %vm559_vm3, %v558_v50, %v544_v51 }
 0x33a   : > { %v564_v54 = vsel %vm562_vm4, %v561_v53, %v546_v52 }
 0x33b   : > { %v567_v56 = vsel %vm565_vm5, %v564_v54, %v548_v55 }
 0x33c   : > { %v570_v58 = vsel %vm568_vm6, %v567_v56, %v550_v46 }
 0x340   : > { %v552_v57 = vpop.permute.xlu2 %551 }
 0x341   : > { %v573_v59 = vsel %vm571_vm7, %v570_v58, %v552_v57 }
 0x342   : > { %v580_v60 = vsel %vm579_vm8, %v573_v59, 0 }
 0x343   : > { %589 = vmatpush.bf16.msra.mxu2 %v580_v60 }
 0x346   : > { %693 = vmatmul.msk.bf16.vlgmr.msra.gmra.mxu2 %vm575_vm9, %v574_v61 }
 0x3c9   : > { %v591_v62 = vpop.f32.mrf.mxu2 }
 0x3ca   : > { %596 = vst.msk [vmem:[%s190_s8] sm:$0xff] %vm595_vm10, %v591_v62 }
 0x3cb   : > { %790 = shalt.err (!%p787_p3)
}
 0x3cc   : > { %702 = dma.vmem_to_hbm [thread:$0]  (%p899_p5), %s611_s9, 128, %s613_s10, %s598_s11  }
 0x3d1   : > { %v593_v63 = vpop.f32.mrf.mxu2 }
 0x3d2 PF: > { %p708_p4 = scmp.ge.s32.totalorder %s825_s18, 2  ;;  %s624_s27 = sand.u32 1, %s813_s15  }
 0x3d3   : > { %s625_s28 = scalar_lea.sflag [#allocation3], %s624_s27 }
 0x3d4   : > { %p705_p7 = pnand %p708_p4, %p903_p6 }
 0x3d6   : > { %p706_p8 = pneg %p705_p7 }
 0x3d8   : > { %808 = dma.done.wait (%p706_p8), %s625_s28, 128  }
 0x3d9   : > { %810 = vsyncadd (%p706_p8), %s625_s28, 4294967168  ;;  %p14_p9 = scmp.ge.s32.totalorder %s886_s21, 4   ;;  %s977_s15 = smov %s817_s16 }
 0x3da   : > { %s978_s16 = smov %s821_s17  ;;  %s979_s17 = smov %s897_s24 }
 0x3db   : > { %s980_s18 = smov %s886_s21  ;;  %16 = sbr.rel (!%p14_p9) target bundleno = 3 (0x3), region = 71 }
 0x3e0   :  { %631 = vsyncpa [#allocation3], 1 }
 0x3e1   :  { %633 = vsyncpa [#allocation3 + $0x1], 1 }

</bundles_post_ra>
